<compile_context>
chip_gen: v7x
topology: tpu7x:2x2x1
jax: 0.10.0
libtpu: 0.0.40
codegen_flags: <defaults>
</compile_context>

<pallas_src>
import functools
import math

import jax
import jax.numpy as jnp
import numpy as np
from jax import lax
from jax.experimental import pallas as pl
from jax.experimental.pallas import tpu as pltpu


def _mshgnn_kernel(x_ref, a_ref, wf_ref, bf_ref, bsum_ref, out_ref,
                   *, K, H, Hd, S, D, neg_slope):
    k = pl.program_id(1)
    G = 2 * H                 # (conv, head) groups, group index g = c*H + h
    HS = H * S
    GS = G * S

    # ---- single fused MXU matmul: [xp_c0 | xp_c1 | a_src_c0 | a_src_c1 | a_dst_c0 | a_dst_c1]
    xk = x_ref[0, 0].astype(jnp.bfloat16)                                        # (S, D)
    fused = jnp.dot(xk, wf_ref[0], preferred_element_type=jnp.float32) + bf_ref[0]

    xp0 = fused[:, :D]                                                           # (S, D)
    xp1 = fused[:, D:2 * D]                                                      # (S, D)
    a_src_t = fused[:, 2 * D:2 * D + G].T                                        # (G, S)
    a_dst = fused[:, 2 * D + G:]                                                 # (S, G)

    # ---- hoisted constant selection masks (2-D iotas only, no integer division) ----
    r_i = lax.broadcasted_iota(jnp.int32, (GS, G), 0)
    g_i = lax.broadcasted_iota(jnp.int32, (GS, G), 1)
    rowmask = ((r_i >= g_i * S) & (r_i < g_i * S + S)).astype(jnp.float32)       # (GS, G)
    # conv selector per row: 0 for rows of conv1 (first HS rows), 1 for conv2
    cflag = (lax.broadcasted_iota(jnp.int32, (GS, 1), 0) >= HS).astype(jnp.int32)
    if H > 1:
        rh_i = lax.broadcasted_iota(jnp.int32, (HS, H), 0)
        gh_i = lax.broadcasted_iota(jnp.int32, (HS, H), 1)
        rowmask_h = ((rh_i >= gh_i * S) & (rh_i < gh_i * S + S)).astype(jnp.float32)  # (HS, H)
        h_i = lax.broadcasted_iota(jnp.int32, (H, D), 0)
        n_i = lax.broadcasted_iota(jnp.int32, (H, D), 1)
        headcols = ((n_i >= h_i * Hd) & (n_i < h_i * Hd + Hd)).astype(jnp.float32)    # (H, D)
        colmask = jnp.dot(rowmask_h, headcols, preferred_element_type=jnp.float32)    # (HS, D)
        ident = (lax.broadcasted_iota(jnp.int32, (S, S), 0)
                 == lax.broadcasted_iota(jnp.int32, (S, S), 1)).astype(jnp.float32)
        sumsel = jnp.concatenate([ident] * H, axis=1)                                 # (S, HS)

    # ---- batched attention logits for BOTH convs and ALL heads -----------------------
    # alpha[g*S + j, i] = a_dst[j, g] + a_src[i, g]   (rows: dst node j of group g; lanes: src i)
    ak_t = a_ref[0, 0].astype(jnp.int32)                                         # (S_dst, S_src)
    ak_rep = jnp.concatenate([ak_t] * G, axis=0)                                 # (GS, S)
    a_dst_rep = jnp.concatenate([a_dst] * G, axis=0)                             # (GS, G)
    dcol = jnp.sum(a_dst_rep * rowmask, axis=1, keepdims=True)                   # (GS, 1)
    srow = jnp.dot(rowmask, a_src_t, preferred_element_type=jnp.float32)         # (GS, S)
    alpha = dcol + srow

    # masked_fill(A_c != 1, 0) == multiply by the 0/1 edge indicator; then leaky_relu(0.2)
    edge = ((ak_rep == 2 + cflag) | (ak_rep == 4)).astype(jnp.float32)
    alpha = alpha * edge
    alpha = jnp.where(alpha >= 0.0, alpha, neg_slope * alpha)

    # stable softmax over source nodes (lane axis); reciprocal on the EUP
    m = jnp.max(alpha, axis=-1, keepdims=True)
    e = jnp.exp(alpha - m)
    p = e * pl.reciprocal(jnp.sum(e, axis=-1, keepdims=True), approx=True)       # (GS, S)

    # ---- attention-weighted aggregation: one MXU matmul per conv, shared head-select ----
    p_bf = p.astype(jnp.bfloat16)
    r0 = jnp.dot(p_bf[:HS], xp0.astype(jnp.bfloat16), preferred_element_type=jnp.float32)
    r1 = jnp.dot(p_bf[HS:], xp1.astype(jnp.bfloat16), preferred_element_type=jnp.float32)
    r_sum = r0 + r1                                                              # (HS, D)
    if H == 1:
        agg = r_sum
    else:
        # keep head h's columns from row-block h and sum blocks (constant 0/1 matmul)
        agg = jnp.dot(sumsel, r_sum * colmask, preferred_element_type=jnp.float32)   # (S, D)

    # add_self_loops (both convs) + conv1.bias + conv2.bias
    h_k = agg + xp0 + xp1 + bsum_ref[0]

    out_ref[0, k] = h_k

    # TODO(synk): dropout (p=0.0 / eval), optional `act` (None) and optional `mask` are identity here.
    # order-mean residual: out_k += mean_k h_k ; output block is K-resident, so read it back.
    @pl.when(k == K - 1)
    def _finalize():
        h_sum = out_ref[0, 0]
        for kk in range(1, K):                                                   # static loop
            h_sum = h_sum + out_ref[0, kk]
        h_mean = h_sum * (1.0 / K)
        for kk in range(K):
            out_ref[0, kk] = out_ref[0, kk] + h_mean


def mshgnn_pallas(x, A, wt, bp, att_src, att_dst, bo, heads):
    """x: (B,K,S,D) f32; A: (B,K,S,S) int edge codes {0..4};
       wt: (2,K,D,D) pre-transposed for x @ wt; bp, bo: (2,K,1,D); att_*: (2,K,H,Hd)."""
    B, K, S, D = x.shape
    H = heads
    Hd = D // H
    Nf = 2 * D + 4 * H

    # (D, H) per-head selection matrices: asrc_sel[c,k,h*Hd+d,g] = att_src[c,k,h,d] * delta(h,g)
    eye = jnp.eye(H, dtype=jnp.float32)
    asrc_sel = jnp.einsum('ckhd,hg->ckhdg', att_src, eye).reshape(2, K, D, H)
    adst_sel = jnp.einsum('ckhd,hg->ckhdg', att_dst, eye).reshape(2, K, D, H)

    # fold attention selections into the projection: a_src = x @ (W @ asrc_sel) + bp @ asrc_sel
    w_as = jnp.einsum('ckde,ckeh->ckdh', wt, asrc_sel)
    w_ad = jnp.einsum('ckde,ckeh->ckdh', wt, adst_sel)
    b_as = jnp.einsum('ckoe,ckeh->ckoh', bp, asrc_sel)
    b_ad = jnp.einsum('ckoe,ckeh->ckoh', bp, adst_sel)

    wf = jnp.concatenate([wt[0], wt[1], w_as[0], w_as[1], w_ad[0], w_ad[1]],
                         axis=-1).astype(jnp.bfloat16)                           # (K, D, 2D+4H)
    bf = jnp.concatenate([bp[0], bp[1], b_as[0], b_as[1], b_ad[0], b_ad[1]], axis=-1)  # (K, 1, Nf)
    bsum = bo[0] + bo[1]                                                         # (K, 1, D)
    a_t = jnp.swapaxes(A, -1, -2).astype(jnp.int8)                               # dst-major codes

    kernel = functools.partial(_mshgnn_kernel, K=K, H=H, Hd=Hd, S=S, D=D, neg_slope=0.2)

    return pl.pallas_call(
        kernel,
        out_shape=jax.ShapeDtypeStruct((B, K, S, D), jnp.float32),
        grid_spec=pltpu.PrefetchScalarGridSpec(
            num_scalar_prefetch=0,
            grid=(B, K),
            in_specs=[
                pl.BlockSpec((1, 1, S, D), lambda b, k: (b, k, 0, 0)),    # x
                pl.BlockSpec((1, 1, S, S), lambda b, k: (b, k, 0, 0)),    # A^T edge codes (int8)
                pl.BlockSpec((1, D, Nf), lambda b, k: (k, 0, 0)),         # fused weights (bf16)
                pl.BlockSpec((1, 1, Nf), lambda b, k: (k, 0, 0)),         # fused bias
                pl.BlockSpec((1, 1, D), lambda b, k: (k, 0, 0)),          # conv1.bias + conv2.bias
            ],
            out_specs=pl.BlockSpec((1, K, S, D), lambda b, k: (b, 0, 0, 0)),
        ),
        compiler_params=pltpu.CompilerParams(
            dimension_semantics=("parallel", "arbitrary")),
    )(x, a_t, wf, bf, bsum)


# ------------------------- pure-JAX (f32) reference -------------------------
def _gat_ref(x, A_mask, wt, bp, att_s, att_d, bo, H):
    B, S, D = x.shape
    Hd = D // H
    xp = jnp.einsum('bsd,de->bse', x, wt) + bp.reshape(1, 1, D)
    xh = xp.reshape(B, S, H, Hd)
    a_s = (xh * att_s[None, None]).sum(-1)                  # (B, S, H)
    a_d = (xh * att_d[None, None]).sum(-1)
    alpha = a_s[:, :, None, :] + a_d[:, None, :, :]         # (B, Ssrc, Sdst, H)
    alpha = jnp.where((A_mask != 1.0)[..., None], 0.0, alpha)
    alpha = jnp.where(alpha >= 0.0, alpha, 0.2 * alpha)
    m = alpha.max(axis=1, keepdims=True)
    e = jnp.exp(alpha - m)
    p = e / e.sum(axis=1, keepdims=True)
    out = jnp.einsum('bijh,bihd->bjhd', p, xh).reshape(B, S, D)
    return out + xp + bo.reshape(1, 1, D)


def _mshgnn_ref(x, A, wt, bp, att_src, att_dst, bo, H):
    B, K, S, D = x.shape
    A1 = ((A == 2) | (A == 4)).astype(jnp.float32)
    A2 = ((A == 3) | (A == 4)).astype(jnp.float32)
    hs = []
    for k in range(K):
        h1 = _gat_ref(x[:, k], A1[:, k], wt[0, k], bp[0, k], att_src[0, k], att_dst[0, k], bo[0, k], H)
        h2 = _gat_ref(x[:, k], A2[:, k], wt[1, k], bp[1, k], att_src[1, k], att_dst[1, k], bo[1, k], H)
        hs.append(h1 + h2)
    h = jnp.stack(hs, axis=1)
    return h + h.mean(axis=1, keepdims=True)


# ------------------------------- demo ----------------------------------------
if __name__ == "__main__":
    B, K, S, D, H = 2, 2, 16, 128, 2          # batch, order, seq_len, hidden, heads
    Hd = D // H
    stdv = 1.0 / math.sqrt(Hd)

    key = jax.random.PRNGKey(0)
    kx, ka, kw, ks, kd, kb1, kb2 = jax.random.split(key, 7)

    x = jax.random.normal(kx, (B, K, S, D), dtype=jnp.float32)
    A = jax.random.randint(ka, (B, K, S, S), 0, 5)                     # integer edge codes {0..4}

    # MSHGNN.reset_parameters: weights/att ~ U(-stdv, stdv); biases init to 0 — small
    # non-zero biases are used here to exercise the bias-folding path.
    wt = jax.random.uniform(kw, (2, K, D, D), minval=-stdv, maxval=stdv, dtype=jnp.float32)
    att_src = jax.random.uniform(ks, (2, K, H, Hd), minval=-stdv, maxval=stdv, dtype=jnp.float32)
    att_dst = jax.random.uniform(kd, (2, K, H, Hd), minval=-stdv, maxval=stdv, dtype=jnp.float32)
    bp = 0.02 * jax.random.normal(kb1, (2, K, 1, D), dtype=jnp.float32)
    bo = 0.02 * jax.random.normal(kb2, (2, K, 1, D), dtype=jnp.float32)

    run = jax.jit(functools.partial(mshgnn_pallas, heads=H))
    out = jax.block_until_ready(run(x, A, wt, bp, att_src, att_dst, bo))

    ref = jax.block_until_ready(_mshgnn_ref(x, A, wt, bp, att_src, att_dst, bo, H))

    assert out.shape == (B, K, S, D)
    # bf16 MXU operands + approximate reciprocal => slightly relaxed tolerance vs f32 reference.
    np.testing.assert_allclose(np.asarray(out), np.asarray(ref), rtol=2e-2, atol=3e-2)
    print("KERNEL_OK")
</pallas_src>

<mosaic_0001>
module attributes {stable_mosaic.version = 11 : i64} {
  func.func @_mshgnn_kernel(%arg0: i32, %arg1: i32, %arg2: memref<1x1x16x128xf32, #tpu.memory_space<vmem>>, %arg3: memref<1x1x16x16xi8, #tpu.memory_space<vmem>>, %arg4: memref<1x128x264xbf16, #tpu.memory_space<vmem>>, %arg5: memref<1x1x264xf32, #tpu.memory_space<vmem>>, %arg6: memref<1x1x128xf32, #tpu.memory_space<vmem>>, %arg7: memref<1x2x16x128xf32, #tpu.memory_space<vmem>>) attributes {dimension_semantics = [#tpu.dimension_semantics<parallel>, #tpu.dimension_semantics<arbitrary>], iteration_bounds = array<i64: 2, 2>, scalar_prefetch = 0 : i64, scratch_operands = 0 : i64, tpu.core_type = #tpu.core_type<tc>, window_params = [{transform_indices = @transform_0, window_bounds = array<i64: 1, 1, 16, 128>}, {transform_indices = @transform_1, window_bounds = array<i64: 1, 1, 16, 16>}, {transform_indices = @transform_2, window_bounds = array<i64: 1, 128, 264>}, {transform_indices = @transform_3, window_bounds = array<i64: 1, 1, 264>}, {transform_indices = @transform_4, window_bounds = array<i64: 1, 1, 128>}, {transform_indices = @transform_5, window_bounds = array<i64: 1, 2, 16, 128>}]} {
    %c0 = arith.constant 0 : index
    %c0_0 = arith.constant 0 : index
    %c0_1 = arith.constant 0 : index
    %c0_2 = arith.constant 0 : index
    %0 = vector.load %arg2[%c0, %c0_0, %c0_1, %c0_2] : memref<1x1x16x128xf32, #tpu.memory_space<vmem>>, vector<1x1x16x128xf32>
    %1 = vector.shape_cast %0 : vector<1x1x16x128xf32> to vector<16x128xf32>
    %2 = arith.truncf %1 : vector<16x128xf32> to vector<16x128xbf16>
    %c0_3 = arith.constant 0 : index
    %c0_4 = arith.constant 0 : index
    %c0_5 = arith.constant 0 : index
    %3 = vector.load %arg4[%c0_3, %c0_4, %c0_5] : memref<1x128x264xbf16, #tpu.memory_space<vmem>>, vector<1x128x264xbf16>
    %4 = vector.shape_cast %3 : vector<1x128x264xbf16> to vector<128x264xbf16>
    %cst = arith.constant dense<0.000000e+00> : vector<16x264xf32>
    %5 = tpu.matmul %2, %4, %cst {dimension_numbers = #tpu.dot_dimension_numbers<[1], [0], [0], [1], [0, 0, 1, 1], [], []>} : vector<16x128xbf16>, vector<128x264xbf16>, vector<16x264xf32> -> vector<16x264xf32>
    %c0_6 = arith.constant 0 : index
    %c0_7 = arith.constant 0 : index
    %c0_8 = arith.constant 0 : index
    %6 = vector.load %arg5[%c0_6, %c0_7, %c0_8] : memref<1x1x264xf32, #tpu.memory_space<vmem>>, vector<1x1x264xf32>
    %7 = vector.shape_cast %6 : vector<1x1x264xf32> to vector<1x264xf32>
    %8 = vector.broadcast %7 : vector<1x264xf32> to vector<16x264xf32>
    %9 = arith.addf %5, %8 : vector<16x264xf32>
    %10 = vector.extract_strided_slice %9 {offsets = [0, 0], sizes = [16, 128], strides = [1, 1]} : vector<16x264xf32> to vector<16x128xf32>
    %11 = vector.extract_strided_slice %9 {offsets = [0, 128], sizes = [16, 128], strides = [1, 1]} : vector<16x264xf32> to vector<16x128xf32>
    %12 = vector.extract_strided_slice %9 {offsets = [0, 256], sizes = [16, 4], strides = [1, 1]} : vector<16x264xf32> to vector<16x4xf32>
    %13 = tpu.transpose %12, [1, 0] : vector<16x4xf32> -> vector<4x16xf32>
    %14 = vector.extract_strided_slice %9 {offsets = [0, 260], sizes = [16, 4], strides = [1, 1]} : vector<16x264xf32> to vector<16x4xf32>
    %15 = tpu.iota {dimensions = array<i32: 0>} : vector<64x4xi32>
    %16 = tpu.iota {dimensions = array<i32: 1>} : vector<64x4xi32>
    %c16_i32 = arith.constant 16 : i32
    %17 = vector.broadcast %c16_i32 : i32 to vector<64x4xi32>
    %18 = arith.muli %16, %17 : vector<64x4xi32>
    %19 = arith.cmpi sge, %15, %18 : vector<64x4xi32>
    %c16_i32_9 = arith.constant 16 : i32
    %20 = vector.broadcast %c16_i32_9 : i32 to vector<64x4xi32>
    %21 = arith.muli %16, %20 : vector<64x4xi32>
    %c16_i32_10 = arith.constant 16 : i32
    %22 = vector.broadcast %c16_i32_10 : i32 to vector<64x4xi32>
    %23 = arith.addi %21, %22 : vector<64x4xi32>
    %24 = arith.cmpi slt, %15, %23 : vector<64x4xi32>
    %25 = arith.andi %19, %24 : vector<64x4xi1>
    %26 = arith.extui %25 : vector<64x4xi1> to vector<64x4xi32>
    %27 = arith.sitofp %26 : vector<64x4xi32> to vector<64x4xf32>
    %28 = tpu.iota {dimensions = array<i32: 0>} : vector<64x1xi32>
    %c32_i32 = arith.constant 32 : i32
    %29 = vector.broadcast %c32_i32 : i32 to vector<64x1xi32>
    %30 = arith.cmpi sge, %28, %29 : vector<64x1xi32>
    %31 = arith.extui %30 : vector<64x1xi1> to vector<64x1xi32>
    %32 = tpu.iota {dimensions = array<i32: 0>} : vector<32x2xi32>
    %33 = tpu.iota {dimensions = array<i32: 1>} : vector<32x2xi32>
    %c16_i32_11 = arith.constant 16 : i32
    %34 = vector.broadcast %c16_i32_11 : i32 to vector<32x2xi32>
    %35 = arith.muli %33, %34 : vector<32x2xi32>
    %36 = arith.cmpi sge, %32, %35 : vector<32x2xi32>
    %c16_i32_12 = arith.constant 16 : i32
    %37 = vector.broadcast %c16_i32_12 : i32 to vector<32x2xi32>
    %38 = arith.muli %33, %37 : vector<32x2xi32>
    %c16_i32_13 = arith.constant 16 : i32
    %39 = vector.broadcast %c16_i32_13 : i32 to vector<32x2xi32>
    %40 = arith.addi %38, %39 : vector<32x2xi32>
    %41 = arith.cmpi slt, %32, %40 : vector<32x2xi32>
    %42 = arith.andi %36, %41 : vector<32x2xi1>
    %43 = arith.extui %42 : vector<32x2xi1> to vector<32x2xi32>
    %44 = arith.sitofp %43 : vector<32x2xi32> to vector<32x2xf32>
    %45 = tpu.iota {dimensions = array<i32: 0>} : vector<2x128xi32>
    %46 = tpu.iota {dimensions = array<i32: 1>} : vector<2x128xi32>
    %c64_i32 = arith.constant 64 : i32
    %47 = vector.broadcast %c64_i32 : i32 to vector<2x128xi32>
    %48 = arith.muli %45, %47 : vector<2x128xi32>
    %49 = arith.cmpi sge, %46, %48 : vector<2x128xi32>
    %c64_i32_14 = arith.constant 64 : i32
    %50 = vector.broadcast %c64_i32_14 : i32 to vector<2x128xi32>
    %51 = arith.muli %45, %50 : vector<2x128xi32>
    %c64_i32_15 = arith.constant 64 : i32
    %52 = vector.broadcast %c64_i32_15 : i32 to vector<2x128xi32>
    %53 = arith.addi %51, %52 : vector<2x128xi32>
    %54 = arith.cmpi slt, %46, %53 : vector<2x128xi32>
    %55 = arith.andi %49, %54 : vector<2x128xi1>
    %56 = arith.extui %55 : vector<2x128xi1> to vector<2x128xi32>
    %57 = arith.sitofp %56 : vector<2x128xi32> to vector<2x128xf32>
    %cst_16 = arith.constant dense<0.000000e+00> : vector<32x128xf32>
    %58 = tpu.matmul %44, %57, %cst_16 {dimension_numbers = #tpu.dot_dimension_numbers<[1], [0], [0], [1], [0, 0, 1, 1], [], []>} : vector<32x2xf32>, vector<2x128xf32>, vector<32x128xf32> -> vector<32x128xf32>
    %59 = tpu.iota {dimensions = array<i32: 0>} : vector<16x16xi32>
    %60 = tpu.iota {dimensions = array<i32: 1>} : vector<16x16xi32>
    %61 = arith.cmpi eq, %59, %60 : vector<16x16xi32>
    %62 = arith.extui %61 : vector<16x16xi1> to vector<16x16xi32>
    %63 = arith.sitofp %62 : vector<16x16xi32> to vector<16x16xf32>
    %64 = tpu.concatenate %63, %63 in 1 : vector<16x16xf32>, vector<16x16xf32> -> vector<16x32xf32>
    %c0_17 = arith.constant 0 : index
    %c0_18 = arith.constant 0 : index
    %c0_19 = arith.constant 0 : index
    %c0_20 = arith.constant 0 : index
    %65 = vector.load %arg3[%c0_17, %c0_18, %c0_19, %c0_20] : memref<1x1x16x16xi8, #tpu.memory_space<vmem>>, vector<1x1x16x16xi8>
    %66 = vector.shape_cast %65 : vector<1x1x16x16xi8> to vector<16x16xi8>
    %67 = arith.extsi %66 : vector<16x16xi8> to vector<16x16xi32>
    %68 = tpu.concatenate %67, %67, %67, %67 in 0 : vector<16x16xi32>, vector<16x16xi32>, vector<16x16xi32>, vector<16x16xi32> -> vector<64x16xi32>
    %69 = tpu.concatenate %14, %14, %14, %14 in 0 : vector<16x4xf32>, vector<16x4xf32>, vector<16x4xf32>, vector<16x4xf32> -> vector<64x4xf32>
    %70 = arith.mulf %69, %27 : vector<64x4xf32>
    %cst_21 = arith.constant dense<0.000000e+00> : vector<64xf32>
    %71 = vector.multi_reduction <add>, %70, %cst_21 [1] : vector<64x4xf32> to vector<64xf32>
    %72 = vector.shape_cast %71 : vector<64xf32> to vector<64x1xf32>
    %cst_22 = arith.constant dense<0.000000e+00> : vector<64x16xf32>
    %73 = tpu.matmul %27, %13, %cst_22 {dimension_numbers = #tpu.dot_dimension_numbers<[1], [0], [0], [1], [0, 0, 1, 1], [], []>} : vector<64x4xf32>, vector<4x16xf32>, vector<64x16xf32> -> vector<64x16xf32>
    %74 = vector.broadcast %72 : vector<64x1xf32> to vector<64x16xf32>
    %75 = arith.addf %74, %73 : vector<64x16xf32>
    %c2_i32 = arith.constant 2 : i32
    %76 = vector.broadcast %c2_i32 : i32 to vector<64x1xi32>
    %77 = arith.addi %76, %31 : vector<64x1xi32>
    %78 = vector.broadcast %77 : vector<64x1xi32> to vector<64x16xi32>
    %79 = arith.cmpi eq, %68, %78 : vector<64x16xi32>
    %c4_i32 = arith.constant 4 : i32
    %80 = vector.broadcast %c4_i32 : i32 to vector<64x16xi32>
    %81 = arith.cmpi eq, %68, %80 : vector<64x16xi32>
    %82 = arith.ori %79, %81 : vector<64x16xi1>
    %83 = arith.extui %82 : vector<64x16xi1> to vector<64x16xi32>
    %84 = arith.sitofp %83 : vector<64x16xi32> to vector<64x16xf32>
    %85 = arith.mulf %75, %84 : vector<64x16xf32>
    %cst_23 = arith.constant 0.000000e+00 : f32
    %86 = vector.broadcast %cst_23 : f32 to vector<64x16xf32>
    %87 = arith.cmpf oge, %85, %86 : vector<64x16xf32>
    %cst_24 = arith.constant 2.000000e-01 : f32
    %88 = vector.broadcast %cst_24 : f32 to vector<64x16xf32>
    %89 = arith.mulf %88, %85 : vector<64x16xf32>
    %90 = arith.select %87, %85, %89 : vector<64x16xi1>, vector<64x16xf32>
    %cst_25 = arith.constant dense<0xFF800000> : vector<64xf32>
    %91 = vector.multi_reduction <maximumf>, %90, %cst_25 [1] : vector<64x16xf32> to vector<64xf32>
    %92 = vector.shape_cast %91 : vector<64xf32> to vector<64x1xf32>
    %93 = vector.broadcast %92 : vector<64x1xf32> to vector<64x16xf32>
    %94 = arith.subf %90, %93 : vector<64x16xf32>
    %95 = math.exp %94 : vector<64x16xf32>
    %cst_26 = arith.constant dense<0.000000e+00> : vector<64xf32>
    %96 = vector.multi_reduction <add>, %95, %cst_26 [1] : vector<64x16xf32> to vector<64xf32>
    %97 = vector.shape_cast %96 : vector<64xf32> to vector<64x1xf32>
    %98 = tpu.reciprocal %97 {approx = true} : vector<64x1xf32> -> vector<64x1xf32>
    %99 = vector.broadcast %98 : vector<64x1xf32> to vector<64x16xf32>
    %100 = arith.mulf %95, %99 : vector<64x16xf32>
    %101 = arith.truncf %100 : vector<64x16xf32> to vector<64x16xbf16>
    %102 = vector.extract_strided_slice %101 {offsets = [0, 0], sizes = [32, 16], strides = [1, 1]} : vector<64x16xbf16> to vector<32x16xbf16>
    %103 = arith.truncf %10 : vector<16x128xf32> to vector<16x128xbf16>
    %cst_27 = arith.constant dense<0.000000e+00> : vector<32x128xf32>
    %104 = tpu.matmul %102, %103, %cst_27 {dimension_numbers = #tpu.dot_dimension_numbers<[1], [0], [0], [1], [0, 0, 1, 1], [], []>} : vector<32x16xbf16>, vector<16x128xbf16>, vector<32x128xf32> -> vector<32x128xf32>
    %105 = vector.extract_strided_slice %101 {offsets = [32, 0], sizes = [32, 16], strides = [1, 1]} : vector<64x16xbf16> to vector<32x16xbf16>
    %106 = arith.truncf %11 : vector<16x128xf32> to vector<16x128xbf16>
    %cst_28 = arith.constant dense<0.000000e+00> : vector<32x128xf32>
    %107 = tpu.matmul %105, %106, %cst_28 {dimension_numbers = #tpu.dot_dimension_numbers<[1], [0], [0], [1], [0, 0, 1, 1], [], []>} : vector<32x16xbf16>, vector<16x128xbf16>, vector<32x128xf32> -> vector<32x128xf32>
    %108 = arith.addf %104, %107 : vector<32x128xf32>
    %109 = arith.mulf %108, %58 : vector<32x128xf32>
    %cst_29 = arith.constant dense<0.000000e+00> : vector<16x128xf32>
    %110 = tpu.matmul %64, %109, %cst_29 {dimension_numbers = #tpu.dot_dimension_numbers<[1], [0], [0], [1], [0, 0, 1, 1], [], []>} : vector<16x32xf32>, vector<32x128xf32>, vector<16x128xf32> -> vector<16x128xf32>
    %111 = arith.addf %110, %10 : vector<16x128xf32>
    %112 = arith.addf %111, %11 : vector<16x128xf32>
    %c0_30 = arith.constant 0 : index
    %c0_31 = arith.constant 0 : index
    %c0_32 = arith.constant 0 : index
    %113 = vector.load %arg6[%c0_30, %c0_31, %c0_32] : memref<1x1x128xf32, #tpu.memory_space<vmem>>, vector<1x1x128xf32>
    %114 = vector.shape_cast %113 : vector<1x1x128xf32> to vector<1x128xf32>
    %115 = vector.broadcast %114 : vector<1x128xf32> to vector<16x128xf32>
    %116 = arith.addf %112, %115 : vector<16x128xf32>
    %c0_33 = arith.constant 0 : index
    %117 = arith.index_cast %arg1 : i32 to index
    %c0_34 = arith.constant 0 : index
    %c0_35 = arith.constant 0 : index
    %118 = vector.load %arg7[%c0_33, %117, %c0_34, %c0_35] : memref<1x2x16x128xf32, #tpu.memory_space<vmem>>, vector<1x1x16x128xf32>
    %119 = vector.shape_cast %118 : vector<1x1x16x128xf32> to vector<16x128xf32>
    %120 = vector.shape_cast %116 : vector<16x128xf32> to vector<1x1x16x128xf32>
    tpu.vector_store %arg7[%c0_33, %117, %c0_34, %c0_35], %120 {strides = array<i32>} : memref<1x2x16x128xf32, #tpu.memory_space<vmem>>, vector<1x1x16x128xf32>,
    %c1_i32 = arith.constant 1 : i32
    %121 = arith.cmpi eq, %arg1, %c1_i32 : i32
    %122 = arith.extui %121 : i1 to i32
    %c0_i32 = arith.constant 0 : i32
    %123 = arith.cmpi ne, %122, %c0_i32 : i32
    scf.if %123 {
      %c0_36 = arith.constant 0 : index
      %c0_37 = arith.constant 0 : index
      %c0_38 = arith.constant 0 : index
      %c0_39 = arith.constant 0 : index
      %124 = vector.load %arg7[%c0_36, %c0_37, %c0_38, %c0_39] : memref<1x2x16x128xf32, #tpu.memory_space<vmem>>, vector<1x1x16x128xf32>
      %125 = vector.shape_cast %124 : vector<1x1x16x128xf32> to vector<16x128xf32>
      %c0_40 = arith.constant 0 : index
      %c1 = arith.constant 1 : index
      %c0_41 = arith.constant 0 : index
      %c0_42 = arith.constant 0 : index
      %126 = vector.load %arg7[%c0_40, %c1, %c0_41, %c0_42] : memref<1x2x16x128xf32, #tpu.memory_space<vmem>>, vector<1x1x16x128xf32>
      %127 = vector.shape_cast %126 : vector<1x1x16x128xf32> to vector<16x128xf32>
      %128 = arith.addf %125, %127 : vector<16x128xf32>
      %cst_43 = arith.constant 5.000000e-01 : f32
      %129 = vector.broadcast %cst_43 : f32 to vector<16x128xf32>
      %130 = arith.mulf %128, %129 : vector<16x128xf32>
      %c0_44 = arith.constant 0 : index
      %c0_45 = arith.constant 0 : index
      %c0_46 = arith.constant 0 : index
      %c0_47 = arith.constant 0 : index
      %131 = vector.load %arg7[%c0_44, %c0_45, %c0_46, %c0_47] : memref<1x2x16x128xf32, #tpu.memory_space<vmem>>, vector<1x1x16x128xf32>
      %132 = vector.shape_cast %131 : vector<1x1x16x128xf32> to vector<16x128xf32>
      %133 = arith.addf %132, %130 : vector<16x128xf32>
      %c0_48 = arith.constant 0 : index
      %c0_49 = arith.constant 0 : index
      %c0_50 = arith.constant 0 : index
      %c0_51 = arith.constant 0 : index
      %134 = vector.load %arg7[%c0_48, %c0_49, %c0_50, %c0_51] : memref<1x2x16x128xf32, #tpu.memory_space<vmem>>, vector<1x1x16x128xf32>
      %135 = vector.shape_cast %134 : vector<1x1x16x128xf32> to vector<16x128xf32>
      %136 = vector.shape_cast %133 : vector<16x128xf32> to vector<1x1x16x128xf32>
      tpu.vector_store %arg7[%c0_48, %c0_49, %c0_50, %c0_51], %136 {strides = array<i32>} : memref<1x2x16x128xf32, #tpu.memory_space<vmem>>, vector<1x1x16x128xf32>,
      %c0_52 = arith.constant 0 : index
      %c1_53 = arith.constant 1 : index
      %c0_54 = arith.constant 0 : index
      %c0_55 = arith.constant 0 : index
      %137 = vector.load %arg7[%c0_52, %c1_53, %c0_54, %c0_55] : memref<1x2x16x128xf32, #tpu.memory_space<vmem>>, vector<1x1x16x128xf32>
      %138 = vector.shape_cast %137 : vector<1x1x16x128xf32> to vector<16x128xf32>
      %139 = arith.addf %138, %130 : vector<16x128xf32>
      %c0_56 = arith.constant 0 : index
      %c1_57 = arith.constant 1 : index
      %c0_58 = arith.constant 0 : index
      %c0_59 = arith.constant 0 : index
      %140 = vector.load %arg7[%c0_56, %c1_57, %c0_58, %c0_59] : memref<1x2x16x128xf32, #tpu.memory_space<vmem>>, vector<1x1x16x128xf32>
      %141 = vector.shape_cast %140 : vector<1x1x16x128xf32> to vector<16x128xf32>
      %142 = vector.shape_cast %139 : vector<16x128xf32> to vector<1x1x16x128xf32>
      tpu.vector_store %arg7[%c0_56, %c1_57, %c0_58, %c0_59], %142 {strides = array<i32>} : memref<1x2x16x128xf32, #tpu.memory_space<vmem>>, vector<1x1x16x128xf32>,
    } else {
    }
    return
  }
  func.func @transform_0(%arg0: i32, %arg1: i32) -> (i32, i32, i32, i32) {
    %c0_i32 = arith.constant 0 : i32
    %c0_i32_0 = arith.constant 0 : i32
    %c0_i32_1 = arith.constant 0 : i32
    return %arg0, %arg1, %c0_i32, %c0_i32_0 : i32, i32, i32, i32
  }
  func.func @transform_1(%arg0: i32, %arg1: i32) -> (i32, i32, i32, i32) {
    %c0_i32 = arith.constant 0 : i32
    %c0_i32_0 = arith.constant 0 : i32
    %c0_i32_1 = arith.constant 0 : i32
    return %arg0, %arg1, %c0_i32, %c0_i32_0 : i32, i32, i32, i32
  }
  func.func @transform_2(%arg0: i32, %arg1: i32) -> (i32, i32, i32) {
    %c0_i32 = arith.constant 0 : i32
    %c0_i32_0 = arith.constant 0 : i32
    %c0_i32_1 = arith.constant 0 : i32
    return %arg1, %c0_i32, %c0_i32_0 : i32, i32, i32
  }
  func.func @transform_3(%arg0: i32, %arg1: i32) -> (i32, i32, i32) {
    %c0_i32 = arith.constant 0 : i32
    %c0_i32_0 = arith.constant 0 : i32
    %c0_i32_1 = arith.constant 0 : i32
    return %arg1, %c0_i32, %c0_i32_0 : i32, i32, i32
  }
  func.func @transform_4(%arg0: i32, %arg1: i32) -> (i32, i32, i32) {
    %c0_i32 = arith.constant 0 : i32
    %c0_i32_0 = arith.constant 0 : i32
    %c0_i32_1 = arith.constant 0 : i32
    return %arg1, %c0_i32, %c0_i32_0 : i32, i32, i32
  }
  func.func @transform_5(%arg0: i32, %arg1: i32) -> (i32, i32, i32, i32) {
    %c0_i32 = arith.constant 0 : i32
    %c0_i32_0 = arith.constant 0 : i32
    %c0_i32_1 = arith.constant 0 : i32
    %c0_i32_2 = arith.constant 0 : i32
    return %arg0, %c0_i32, %c0_i32_0, %c0_i32_1 : i32, i32, i32, i32
  }
}

</mosaic_0001>

<bundles_post_ra>
// kernel: mshgnn_pallas.1
= control target key start
LH: loop header
LB: loop body
LE: loop exit
PB: predicated region body
PF: predicated region fallthrough
CT: control target
= control target key end

     0   :  { %10 = vsyncpa [#allocation3], 0  ;;  %s2517_s0 = inlined_call_operand.vmem [shape: f32[2,2,16,128], index: 0, kind: input, shape index: {}]   ;;  %s2518_s1 = inlined_call_operand.vmem [shape: s8[2,2,16,16], index: 1, kind: input, shape index: {}]   ;;  %s2519_s2 = inlined_call_operand.vmem [shape: bf16[2,128,264], index: 2, kind: input, shape index: {}]   ;;  %s2520_s3 = inlined_call_operand.vmem [shape: f32[2,1,264], index: 3, kind: input, shape index: {}]   ;;  %s2521_s4 = inlined_call_operand.vmem [shape: f32[2,1,128], index: 4, kind: input, shape index: {}]   ;;  %s2522_s5 = inlined_call_operand.hbm [shape: f32[2,2,16,128], index: 5, kind: output, shape index: {}]  }
   0x1   :  { %12 = vsyncpa [#allocation3 + $0x1], 0  ;;  %s2102_s18 = smov 0   ;;  %s2104_s19 = smov 0  }
   0x2   :  { %s2106_s20 = smov 0   ;;  %s2108_s21 = smov 0  }
   0x3   :  { %s2110_s22 = smov 0   ;;  %s2112_s23 = smov 0  }
   0x4   :  { %s2114_s24 = smov 0   ;;  %s2116_s25 = smov 0  }
   0x5 LB: > { %s1580_s26 = sadd.s32 4294967295, %s2061_s25   ;;  %s1581_s27 = sadd.s32 4294967294, %s2061_s25   ;;  %s2061_s25 = sphi %s2116_s25, %s18_s25   ;;  %s2057_s24 = sphi %s2114_s24, %s2531_s24   ;;  %s2053_s23 = sphi %s2112_s23, %s2530_s23   ;;  %s2049_s22 = sphi %s2110_s22, %s2529_s22   ;;  %s2045_s21 = sphi %s2108_s21, %s2528_s21   ;;  %s2041_s20 = sphi %s2106_s20, %s2527_s20   ;;  %s2037_s19 = sphi %s2104_s19, %s2526_s19   ;;  %s2033_s18 = sphi %s2102_s18, %s2525_s18  }
   0x6   : > { %s27_s28 = sadd.s32 1, %s2053_s23  ;;  %s30_s29 = sadd.s32 1, %s2057_s24 }
   0x7   : > { %p28_p0 = scmp.ge.s32.totalorder %s27_s28, 2  ;;  %p181_p1 = scmp.ne.s32.totalorder %s2041_s20, %s2037_s19 }
   0x8   : > { %p182_p2 = scmp.eq.s32.totalorder %s1580_s26, 3  ;;  %p187_p4 = scmp.ne.s32.totalorder %s2037_s19, %s2033_s18 }
   0x9   : > { %s2533_s28 = smov (%p28_p0, %s27_s28), 0  ;;  %s2535_s29 = smov (!%p28_p0, %s30_s29), %s2057_s24 }
   0xa   : > { %p2151_p3 = por %p182_p2, %p181_p1  ;;  %p32_p5 = scmp.ge.s32.totalorder %s2535_s29, 2 }
   0xb   : > { %p188_p6 = scmp.eq.s32.totalorder %s1581_s27, 3  ;;  %p1584_p7 = scmp.ge.s32.totalorder %s2061_s25, 1 }
   0xc   : > { %p251_p8 = scmp.lt.s32.totalorder %s2061_s25, 5  ;;  %s2537_s29 = smov (%p32_p5, %s2535_s29), 0 }
   0xd   : > { %p2161_p9 = por %p188_p6, %p187_p4  ;;  %s168_s7 = ssub.s32 %s2057_s24, %s2537_s29 }
   0xe   : > { %p252_p10 = pnand %p1584_p7, %p251_p8  ;;  %s171_s8 = sadd.s32 1, %s2041_s20 }
   0xf   : > { %p169_p11 = scmp.eq.s32.totalorder %s168_s7, 0  ;;  %p306_p12 = scmp.lt.s32.totalorder (!%p252_p10), %s2045_s21, 1  ;;  %v372_v0 = vlaneseq (!%p252_p10)  ;;  %v2063_v1 = vmov (!%p252_p10), 0.0   ;;  %vm2064_vm0 = vmmov (!%p252_p10), 0  }
  0x10   : > { %255 = sbr.rel (%p252_p10) target bundleno = 1365 (0x555), region = 40  ;;  %1712 = vmatprep.subr.bf16.mxu1 (!%p252_p10), %v2063_v1  ;;  %1728 = vmatprep.mubr.msk.bf16.mxu1 (!%p252_p10), %vm2064_vm0, %v2063_v1  ;;  %p304_p13 = scmp.lt.s32.totalorder (!%p252_p10), %s2049_s22, 1 }
  0x11   : > { %s2169_s9 = scalar_select %p169_p11, %s2041_s20, %s171_s8  }
  0x12   : > { %v2177_v2 = vshrl.u32 (!%p252_p10), %v372_v0, 7  ;;  %v2179_v3 = vand.u32 (!%p252_p10), 127, %v372_v0  ;;  %s2065_s16 = smov (!%p252_p10), 4   ;;  %p1659_p0 = scmp.ne.s32.totalorder (!%p252_p10), %s2045_s21, 1 }
  0x14   : > { %v610_v4 = vmul.u32 (!%p252_p10), 16, %v2179_v3  ;;  %v604_v5 = vadd.s32 (!%p252_p10), 32, %v2177_v2  ;;  %v605_v7 = vadd.s32 (!%p252_p10), 40, %v2177_v2  ;;  %v2195_v10 = vadd.s32 (!%p252_p10), 8, %v2177_v2 }
  0x15   : > { %v606_v11 = vadd.s32 (!%p252_p10), 48, %v2177_v2  ;;  %v607_v13 = vadd.s32 (!%p252_p10), 56, %v2177_v2  ;;  %v602_v14 = vadd.s32 (!%p252_p10), 16, %v2177_v2  ;;  %v603_v16 = vadd.s32 (!%p252_p10), 24, %v2177_v2 }
  0x16   : > { %v619_v8 = vadd.s32 (!%p252_p10), 16, %v610_v4  ;;  %vm615_vm1 = vcmp.ge.s32.totalorder (!%p252_p10), %v604_v5, %v610_v4  ;;  %vm616_vm3 = vcmp.ge.s32.totalorder (!%p252_p10), %v605_v7, %v610_v4  ;;  %vm611_vm6 = vcmp.ge.s32.totalorder (!%p252_p10), %v2177_v2, %v610_v4 }
  0x17   : > { %s2175_s10 = scalar_select %p306_p12, %s2045_s21, 1  ;;  %vm612_vm9 = vcmp.ge.s32.totalorder %v2195_v10, %v610_v4  ;;  %vm617_vm11 = vcmp.ge.s32.totalorder %v606_v11, %v610_v4  ;;  %vm618_vm14 = vcmp.ge.s32.totalorder %v607_v13, %v610_v4  ;;  %v382_v36 = vsub.s32 2, %v2177_v2 }
  0x18   : > { %vm624_vm2 = vcmp.lt.s32.totalorder %v604_v5, %v619_v8  ;;  %vm625_vm4 = vcmp.lt.s32.totalorder %v605_v7, %v619_v8  ;;  %vm620_vm7 = vcmp.lt.s32.totalorder %v2177_v2, %v619_v8  ;;  %vm621_vm10 = vcmp.lt.s32.totalorder %v2195_v10, %v619_v8  ;;  %s2214_s15 = scalar_select %p304_p13, %s2049_s22, 1 }
  0x19   : > { %s1797_s11 = smul.u32 192, %s2175_s10  ;;  %vm632_vm5 = vmand %vm615_vm1, %vm624_vm2  ;;  %vm626_vm12 = vcmp.lt.s32.totalorder %v606_v11, %v619_v8  ;;  %vm627_vm15 = vcmp.lt.s32.totalorder %v607_v13, %v619_v8  ;;  %vm613_vm1 = vcmp.ge.s32.totalorder %v602_v14, %v610_v4  ;;  %vm622_vm2 = vcmp.lt.s32.totalorder %v602_v14, %v619_v8  ;;  %s1586_s17 = sshll.u32 %s2175_s10, 1 }
  0x1a   : > { %vm633_vm8 = vmand %vm616_vm3, %vm625_vm4  ;;  %v2205_v15 = vsel %vm632_vm5, 1.0, %v2063_v1  ;;  %vm614_vm4 = vcmp.ge.s32.totalorder %v603_v16, %v610_v4  ;;  %vm623_vm5 = vcmp.lt.s32.totalorder %v603_v16, %v619_v8  ;;  %s1587_s26 = sshll.u32 %s2214_s15, 2  ;;  %s1798_s13 = smul.u32 3, %s2175_s10 }
  0x1b   : > { %s2186_s14 = scalar_lea.vmem %s2519_s2, %s1797_s11  ;;  %v2217_v18 = vsel %vm633_vm8, 1.0, %v2063_v1  ;;  %vm628_vm13 = vmand %vm611_vm6, %vm620_vm7  ;;  %s2254_s27 = sadd.s32 %s1587_s26, %s1586_s17 }
  0x1c   : > { %v1903_v6 = vld [vmem:[%s2186_s14 + $0x8] ss:$12 sps:$4 sm:$0xff]   ;;  %v1904_v9 = vld [vmem:[%s2186_s14 + $0x20] ss:$12 sps:$4 sm:$0xff]   ;;  %v1905_v12 = vld [vmem:[%s2186_s14 + $0x38] ss:$12 sps:$4 sm:$0xff]   ;;  %v1878_v19 = vpack.i.bf16 %v2217_v18, %v2205_v15  ;;  %s330_s17 = scalar_lea.vmem %s2520_s3, %s1798_s13 }
  0x1d   : > { %1713 = vmatpush3.bf16.msra.mxu1 %v1903_v6  ;;  %v1906_v17 = vld [vmem:[%s2186_s14 + $0x50] ss:$12 sps:$4 sm:$0xff]   ;;  %vm629_vm0 = vmand %vm612_vm9, %vm621_vm10  ;;  %v2227_v20 = vsel %vm628_vm13, 1.0, %v2063_v1  ;;  %v1907_v21 = vld [vmem:[%s2186_s14 + $0x68] ss:$12 sps:$4 sm:$0xff]   ;;  %s1588_s7 = sshll.u32 %s2254_s27, 3 }
  0x1e   : > { %1714 = vmatprep.subr.bf16.mxu1 %v2063_v1  ;;  %1879 = vrot.lane.b32.xlu0 %v1878_v19, %s2065_s16  ;;  %v2231_v22 = vsel %vm629_vm0, 1.0, %v2063_v1  ;;  %vm634_vm3 = vmand %vm617_vm11, %vm626_vm12  ;;  %v1908_v29 = vld [vmem:[%s2186_s14 + $0x80] ss:$12 sps:$4 sm:$0xff]   ;;  %v1909_v31 = vld [vmem:[%s2186_s14 + $0x98] ss:$12 sps:$4 sm:$0xff]   ;;  %s312_s12 = scalar_lea.vmem %s2517_s0, %s1588_s7  ;;  %vm866_vm9 = vcmask 31744  }
  0x1f   : > { %v1888_v23 = vpack.i.bf16 %v2231_v22, %v2227_v20  ;;  %vm635_vm6 = vmand %vm618_vm14, %vm627_vm15  ;;  %v2241_v24 = vsel %vm634_vm3, 1.0, %v2063_v1  ;;  %v1910_v32 = vld [vmem:[%s2186_s14 + $0xb0] ss:$12 sps:$4 sm:$0xff]   ;;  %v335_v33 = vld [vmem:[%s312_s12] sm:$0xff]  ;;  %s2066_s26 = smov 124   ;;  %s1591_s7 = sshll.u32 %s2254_s27, 1 }
  0x20   : > { %v2245_v25 = vsel %vm635_vm6, 1.0, %v2063_v1  ;;  %vm630_vm7 = vmand %vm613_vm1, %vm622_vm2  ;;  %v336_v34 = vld [vmem:[%s312_s12 + $0x8] sm:$0xff]  ;;  %v2281_v38 = vld [vmem:[%s330_s17] sm:$0x7]  ;;  %s321_s12 = scalar_lea.vmem %s2518_s1, %s1591_s7  ;;  %vm791_vm2 = vcmask 130048   ;;  %s301_s27 = sand.u32 1, %s2037_s19  }
  0x21   : > { %1715 = vmatpush3.bf16.msra.mxu1 %v1904_v9  ;;  %1889 = vrot.lane.b32.xlu1 %v1888_v23, %s2065_s16  ;;  %v1883_v26 = vpack.i.bf16 %v2245_v25, %v2241_v24  ;;  %vm631_vm8 = vmand %vm614_vm4, %vm623_vm5  ;;  %v2252_v27 = vsel %vm630_vm7, 1.0, %v2063_v1  ;;  %v2271_v35 = vpack.c.bf16 %v336_v34, %v335_v33  ;;  %v383_v39 = vrot.slane %v2281_v38, %v382_v36  ;;  %v1920_v33 = vld [vmem:[%s2186_s14 + $0x4c] ss:$12 sps:$4 sm:$0xff]   ;;  %v1922_v34 = vld [vmem:[%s2186_s14 + $0x48] ss:$12 sps:$4 sm:$0xff]   ;;  %s1585_s13 = sshll.u32 %s301_s27, 5  ;;  %s333_s17 = scalar_lea.vmem %s2521_s4, %s2175_s10 }
  0x22   : > { %1716 = vmatprep.subr.bf16.mxu1 %v2063_v1  ;;  %v2257_v28 = vsel %vm631_vm8, 1.0, %v2063_v1  ;;  %vm1780_vm10 = vmpackc.low %vm866_vm9, %vm866_vm9  ;;  %v1923_v36 = vld [vmem:[%s2186_s14 + $0x64] ss:$12 sps:$4 sm:$0xff]   ;;  %s2441_s7 = scalar_lea.vmem [#allocation2], %s1585_s13 }
  0x23   : > { %1884 = vrot.lane.b32.xlu0 %v1883_v26, %s2065_s16  ;;  %v1893_v30 = vpack.i.bf16 %v2257_v28, %v2252_v27  ;;  %v1914_v26 = vld [vmem:[%s2186_s14 + $0x1c] ss:$12 sps:$4 sm:$0xff]  }
  0x25   : > { %1717 = vmatpush3.bf16.msra.mxu1 %v1905_v12  ;;  %1894 = vrot.lane.b32.xlu1 %v1893_v30, %s2065_s16  ;;  %v1917_v30 = vld [vmem:[%s2186_s14 + $0x34] ss:$12 sps:$4 sm:$0xff]  }
  0x26   : > { %1718 = vmatprep.subr.bf16.mxu1 %v2063_v1 }
  0x29   : > { %1719 = vmatpush3.bf16.msra.mxu1 %v1906_v17 }
  0x2a   : > { %1720 = vmatprep.subr.bf16.mxu1 %v2063_v1 }
  0x2d   : > { %1721 = vmatpush3.bf16.msra.mxu1 %v1907_v21 }
  0x2e   : > { %1722 = vmatprep.subr.bf16.mxu1 %v2063_v1 }
  0x31   : > { %1723 = vmatpush3.bf16.msra.mxu1 %v1908_v29  ;;  %v1916_v29 = vld [vmem:[%s2186_s14 + $0x18] ss:$12 sps:$4 sm:$0xff]  }
  0x32   : > { %1724 = vmatprep.subr.bf16.mxu1 %v2063_v1 }
  0x35   : > { %1725 = vmatpush3.bf16.msra.mxu1 %v1909_v31  ;;  %v2067_v31 = vmov 0  }
  0x36   : > { %1726 = vmatprep.subr.bf16.mxu1 %v2063_v1  ;;  %547 = vmatprep.mubr.bf16.mxu0 %v2067_v31 }
  0x39   : > { %1727 = vmatpush3.bf16.msra.mxu1 %v1910_v32  ;;  %v1919_v32 = vld [vmem:[%s2186_s14 + $0x30] ss:$12 sps:$4 sm:$0xff]  }
  0x3c   : > { %1729 = vmatmul.mubr.bf16.vlgmr.msra.gmra.mrb[0].mxu1 %v2271_v35 }
  0x3d   : > { %1744 = vmatprep.mubr.msk.f32.mxu1 %vm866_vm9, %v2227_v20 }
  0x90   : > { %v1880_v37 = vpop.permute.xlu0 %1879 }
  0x91   : > { %v1881_v40 = vunpack.i.l.bf16 %v1880_v37  ;;  %v1882_v47 = vunpack.i.h.bf16 %v1880_v37  ;;  %v1925_v37 = vld [vmem:[%s2186_s14 + $0x60] ss:$12 sps:$4 sm:$0xff]  }
  0x93   : > { %v1890_v45 = vpop.permute.xlu1 %1889 }
  0x94   : > { %v1891_v55 = vunpack.i.l.bf16 %v1890_v45  ;;  %v1892_v58 = vunpack.i.h.bf16 %v1890_v45 }
  0x95   : > { %v1885_v41 = vpop.permute.xlu0 %1884 }
  0x96   : > { %v1886_v48 = vunpack.i.l.bf16 %v1885_v41  ;;  %v1887_v52 = vunpack.i.h.bf16 %v1885_v41  ;;  %v1929_v41 = vld [vmem:[%s2186_s14 + $0x94] ss:$12 sps:$4 sm:$0xff]  }
  0x97   : > { %v1895_v57 = vpop.permute.xlu1 %1894 }
  0x98   : > { %v1896_v60 = vunpack.i.l.bf16 %v1895_v57  ;;  %v1897_v62 = vunpack.i.h.bf16 %v1895_v57 }
 0x10f   : > { %v592_v42 = vpop.f32.mrb[0].mxu1 }
 0x110   : > { %v593_v43 = vadd.f32 %v592_v42, %v383_v39  ;;  %v1730_v44 = vpop.f32.mrb[1].mxu1  ;;  %v1931_v42 = vld [vmem:[%s2186_s14 + $0x90] ss:$12 sps:$4 sm:$0xff]  }
 0x111   : > { %v595_v46 = vpop.f32.mrb[2].mxu1  ;;  %v1934_v44 = vld [vmem:[%s2186_s14 + $0xa8] ss:$12 sps:$4 sm:$0xff]  }
 0x112   : > { %v596_v49 = vadd.f32 %v595_v46, %v383_v39  ;;  %v1731_v50 = vpop.f32.mrb[3].mxu1  ;;  %v830_v51 = vmul.f32 %v1881_v40, %v593_v43  ;;  %v832_v56 = vmul.f32 %v1886_v48, %v593_v43  ;;  %v826_v61 = vmul.f32 %v1891_v55, %v593_v43  ;;  %v1926_v39 = vld [vmem:[%s2186_s14 + $0x7c] ss:$12 sps:$4 sm:$0xff]   ;;  %v1928_v40 = vld [vmem:[%s2186_s14 + $0x78] ss:$12 sps:$4 sm:$0xff]  }
 0x113   : > { %v828_v0 = vmul.f32 %v1896_v60, %v593_v43 }
 0x114   : > { %850 = vrot.lane.b32.xlu0 %v830_v51, %s2066_s26  ;;  %v1779_v53 = vpack.c.bf16 %v596_v49, %v593_v43  ;;  %v831_v54 = vmul.f32 %v1882_v47, %v596_v49  ;;  %v833_v59 = vmul.f32 %v1887_v52, %v596_v49  ;;  %v827_v63 = vmul.f32 %v1892_v58, %v596_v49  ;;  %v1932_v43 = vld [vmem:[%s2186_s14 + $0xac] ss:$12 sps:$4 sm:$0xff]  }
 0x115   : > { %v829_v4 = vmul.f32 %v1897_v62, %v596_v49 }
 0x116   : > { %1781 = vmatprep.subr.msk.bf16.mxu1 %vm1780_vm10, %v1779_v53  ;;  %852 = vrot.lane.b32.xlu1 %v831_v54, %s2066_s26 }
 0x117   : > { %1784 = vmatpush3.bf16.xpose.msk.msra.mxu1 %vm1780_vm10, %v1779_v53  ;;  %v1673_v53 = vld [vmem:[%s321_s12] sm:$0xf]  }
 0x118   : > { %854 = vrot.lane.b32.xlu0 %v832_v56, %s2066_s26  ;;  %v1674_v54 = vunpack.c.0.s8 %v1673_v53  ;;  %v1675_v55 = vunpack.c.1.s8 %v1673_v53 }
 0x11a   : > { %856 = vrot.lane.b32.xlu1 %v833_v59, %s2066_s26  ;;  %vm1038_vm11 = vcmp.eq.s32.totalorder %v1674_v54, 3  ;;  %vm1042_vm12 = vcmp.eq.s32.totalorder %v1674_v54, 4  ;;  %vm1039_vm13 = vcmp.eq.s32.totalorder %v1675_v55, 3  ;;  %vm1043_vm14 = vcmp.eq.s32.totalorder %v1675_v55, 4 }
 0x11b   : > { %vm1048_vm15 = vmor %vm1038_vm11, %vm1042_vm12  ;;  %vm1034_vm1 = vcmp.eq.s32.totalorder %v1674_v54, 2  ;;  %vm1035_vm5 = vcmp.eq.s32.totalorder %v1675_v55, 2 }
 0x11c   : > { %842 = vrot.lane.b32.xlu0 %v826_v61, %s2066_s26  ;;  %vm1049_vm0 = vmor %vm1039_vm13, %vm1043_vm14  ;;  %v1647_v56 = vsel %vm1048_vm15, 1.0, %v2063_v1 }
 0x11d   : > { %v1648_v58 = vsel %vm1049_vm0, 1.0, %v2063_v1  ;;  %vm1044_vm3 = vmor %vm1034_vm1, %vm1042_vm12  ;;  %vm688_vm1 = vcmask 1041408  }
 0x11e   : > { %844 = vrot.lane.b32.xlu1 %v827_v63, %s2066_s26  ;;  %1745 = vmatmul.mubr.msk.f32.vlgmr.msra.gmra.mrb[4].mxu1 %vm866_vm9, %v2231_v22  ;;  %vm1045_vm7 = vmor %vm1035_vm5, %vm1043_vm14  ;;  %vm778_vm5 = vcmp.eq.s32.totalorder %v2195_v10, %v2179_v3 }
 0x11f   : > { %1747 = vmatprep.mubr.msk.f32.mxu1 %vm866_vm9, %v2252_v27 }
 0x120   : > { %846 = vrot.lane.b32.xlu0 %v828_v0, %s2066_s26 }
 0x122   : > { %848 = vrot.lane.b32.xlu1 %v829_v4, %s2066_s26  ;;  %1748 = vmatmul.mubr.msk.f32.gmra.mrb[6].mxu1 %vm866_vm9, %v2257_v28  ;;  %s1658_s26 = sshll.u32 %s2045_s21, 4 }
 0x123   : > { %1750 = vmatprep.mubr.msk.f32.mxu1 %vm866_vm9, %v2205_v15  ;;  %s1402_s8 = scalar_lea.vmem %s2441_s7, %s1658_s26 [#allocation2] }
 0x126   : > { %1751 = vmatmul.mubr.msk.f32.gmra.mrb[8].mxu1 %vm866_vm9, %v2217_v18 }
 0x127   : > { %1753 = vmatprep.mubr.msk.f32.mxu1 %vm866_vm9, %v2241_v24  ;;  %v1911_v24 = vld [vmem:[%s2186_s14 + $0x4] ss:$12 sps:$4 sm:$0xff]  }
 0x128   : > { %515 = vmatprep.subr.bf16.mxu0 %v1911_v24 }
 0x12a   : > { %1754 = vmatmul.mubr.msk.f32.gmra.mrb[10].mxu1 %vm866_vm9, %v2245_v25  ;;  %v1913_v25 = vld [vmem:[%s2186_s14] ss:$12 sps:$4 sm:$0xff]   ;;  %s2068_s14 = smov 16  }
 0x12b   : > { %516 = vmatpush1.bf16.msra.mxu0 %v1913_v25 }
 0x12c   : > { %517 = vmatprep.subr.bf16.mxu0 %v1914_v26 }
 0x12f   : > { %518 = vmatpush1.bf16.msra.mxu0 %v1916_v29 }
 0x130   : > { %519 = vmatprep.subr.bf16.mxu0 %v1917_v30 }
 0x133   : > { %520 = vmatpush1.bf16.msra.mxu0 %v1919_v32 }
 0x134   : > { %521 = vmatprep.subr.bf16.mxu0 %v1920_v33 }
 0x137   : > { %522 = vmatpush1.bf16.msra.mxu0 %v1922_v34 }
 0x138   : > { %523 = vmatprep.subr.bf16.mxu0 %v1923_v36 }
 0x13b   : > { %524 = vmatpush1.bf16.msra.mxu0 %v1925_v37 }
 0x13c   : > { %525 = vmatprep.subr.bf16.mxu0 %v1926_v39 }
 0x13f   : > { %526 = vmatpush1.bf16.msra.mxu0 %v1928_v40 }
 0x140   : > { %527 = vmatprep.subr.bf16.mxu0 %v1929_v41 }
 0x143   : > { %528 = vmatpush1.bf16.msra.mxu0 %v1931_v42 }
 0x144   : > { %529 = vmatprep.subr.bf16.mxu0 %v1932_v43 }
 0x147   : > { %530 = vmatpush1.bf16.msra.mxu0 %v1934_v44 }
 0x14a   : > { %548 = vmatmul.mubr.bf16.vlgmr.msra.gmra.mrb[0].mxu0 %v2271_v35 }
 0x186   : > { %v851_v5 = vpop.permute.xlu0 %850 }
 0x187   : > { %v879_v6 = vsel %vm866_vm9, %v851_v5, 0.0 }
 0x188   : > { %880 = vadd.xlane.f32.xlu0 %v879_v6  ;;  %v853_v7 = vpop.permute.xlu1 %852 }
 0x189   : > { %v882_v8 = vsel %vm866_vm9, %v853_v7, 0.0 }
 0x18a   : > { %v855_v9 = vpop.permute.xlu0 %854  ;;  %883 = vadd.xlane.f32.xlu1 %v882_v8 }
 0x18b   : > { %v885_v11 = vsel %vm866_vm9, %v855_v9, 0.0  ;;  %v1643_v9 = vsel %vm1044_vm3, 1.0, %v2063_v1  ;;  %vm675_vm3 = vcmask 15360  }
 0x18c   : > { %886 = vadd.xlane.f32.xlu0 %v885_v11  ;;  %v857_v12 = vpop.permute.xlu1 %856  ;;  %1734 = vmatprep.mubr.msk.f32.mxu0 %vm675_vm3, %v2227_v20 }
 0x18d   : > { %v888_v14 = vsel %vm866_vm9, %v857_v12, 0.0 }
 0x18e   : > { %v843_v13 = vpop.permute.xlu0 %842 }
 0x18f   : > { %v867_v15 = vsel %vm866_vm9, %v843_v13, 0.0 }
 0x190   : > { %889 = vadd.xlane.f32.xlu0 %v888_v14  ;;  %868 = vadd.xlane.f32.xlu1 %v867_v15  ;;  %v845_v16 = vpop.permute.xlu1 %844 }
 0x191   : > { %v870_v19 = vsel %vm866_vm9, %v845_v16, 0.0 }
 0x192   : > { %v847_v17 = vpop.permute.xlu0 %846 }
 0x193   : > { %v873_v18 = vsel %vm866_vm9, %v847_v17, 0.0 }
 0x194   : > { %874 = vadd.xlane.f32.xlu1 %v873_v18  ;;  %871 = vadd.xlane.f32.xlu0 %v870_v19  ;;  %v849_v21 = vpop.permute.xlu1 %848 }
 0x195   : > { %v876_v23 = vsel %vm866_vm9, %v849_v21, 0.0  ;;  %v1644_v21 = vsel %vm1045_vm7, 1.0, %v2063_v1 }
 0x198   : > { %877 = vadd.xlane.f32.xlu0 %v876_v23 }
 0x1f1   : > { %v1746_v45 = vpop.f32.mrb[4].mxu1 }
 0x1f2   : > { %v979_v46 = vpop.f32.mrb[5].mxu1 }
 0x1f5   : > { %v2325_v47 = vpop.f32.mrb[6].mxu1 }
 0x1f6   : > { %v989_v48 = vpop.f32.mrb[7].mxu1 }
 0x1f9   : > { %v1752_v49 = vpop.f32.mrb[8].mxu1 }
 0x1fa   : > { %v999_v50 = vpop.f32.mrb[9].mxu1 }
 0x1fd   : > { %v1755_v51 = vpop.f32.mrb[10].mxu1 }
 0x1fe   : > { %v1009_v52 = vpop.f32.mrb[11].mxu1 }
 0x215   : > { %v881_v35 = vpop.xlane.xlu0 %880 }
 0x216   : > { %v1022_v57 = vadd.f32 %v999_v50, %v881_v35 }
 0x217   : > { %v884_v59 = vpop.xlane.xlu1 %883 }
 0x218   : > { %v1072_v60 = vmul.f32 %v1647_v56, %v1022_v57  ;;  %v1023_v61 = vadd.f32 %v1752_v49, %v884_v59 }
 0x219   : > { %v887_v62 = vpop.xlane.xlu0 %886 }
 0x21a   : > { %v1073_v63 = vmul.f32 %v1648_v58, %v1023_v61  ;;  %v1024_v0 = vadd.f32 %v1009_v52, %v887_v62  ;;  %vm1080_vm4 = vcmp.ge.f32.partialorder %v1072_v60, 0.0  ;;  %v1088_v4 = vmul.f32 0.2, %v1072_v60 }
 0x21c   : > { %v1074_v5 = vmul.f32 %v1647_v56, %v1024_v0  ;;  %v1096_v6 = vsel %vm1080_vm4, %v1072_v60, %v1088_v4  ;;  %vm1081_vm6 = vcmp.ge.f32.partialorder %v1073_v63, 0.0  ;;  %v1089_v7 = vmul.f32 0.2, %v1073_v63 }
 0x21d   : > { %v890_v8 = vpop.xlane.xlu0 %889  ;;  %v869_v11 = vpop.xlane.xlu1 %868  ;;  %v1112_v12 = vsel %vm791_vm2, %v1096_v6, -inf  ;;  %vm777_vm4 = vcmp.eq.s32.totalorder %v2177_v2, %v2179_v3 }
 0x21e   : > { %v1025_v13 = vadd.f32 %v1755_v51, %v890_v8  ;;  %v1018_v14 = vadd.f32 %v979_v46, %v869_v11  ;;  %1113 = vmax.xlane.f32.xlu1 %v1112_v12  ;;  %v1097_v15 = vsel %vm1081_vm6, %v1073_v63, %v1089_v7  ;;  %vm1082_vm8 = vcmp.ge.f32.partialorder %v1074_v5, 0.0 }
 0x21f   : > { %v1115_v16 = vsel %vm791_vm2, %v1097_v15, -inf  ;;  %v1090_v17 = vmul.f32 0.2, %v1074_v5  ;;  %v1631_v20 = vsel %vm777_vm4, 1.0, %v2063_v1  ;;  %vm1308_vm6 = vcmask 261120  }
 0x220   : > { %v1075_v18 = vmul.f32 %v1648_v58, %v1025_v13  ;;  %v1068_v19 = vmul.f32 %v1643_v9, %v1018_v14  ;;  %1116 = vmax.xlane.f32.xlu0 %v1115_v16 }
 0x221   : > { %v872_v23 = vpop.xlane.xlu0 %871  ;;  %v875_v24 = vpop.xlane.xlu1 %874  ;;  %v1098_v25 = vsel %vm1082_vm8, %v1074_v5, %v1090_v17 }
 0x222   : > { %v1019_v26 = vadd.f32 %v1746_v45, %v872_v23  ;;  %v1020_v29 = vadd.f32 %v989_v48, %v875_v24  ;;  %v1118_v30 = vsel %vm791_vm2, %v1098_v25, -inf  ;;  %vm1083_vm9 = vcmp.ge.f32.partialorder %v1075_v18, 0.0 }
 0x223   : > { %1119 = vmax.xlane.f32.xlu1 %v1118_v30  ;;  %v1091_v31 = vmul.f32 0.2, %v1075_v18  ;;  %vm1076_vm10 = vcmp.ge.f32.partialorder %v1068_v19, 0.0  ;;  %v1084_v32 = vmul.f32 0.2, %v1068_v19 }
 0x224   : > { %v1069_v33 = vmul.f32 %v1644_v21, %v1019_v26  ;;  %v1070_v34 = vmul.f32 %v1643_v9, %v1020_v29 }
 0x225   : > { %v878_v36 = vpop.xlane.xlu0 %877  ;;  %v1099_v37 = vsel %vm1083_vm9, %v1075_v18, %v1091_v31  ;;  %v1092_v39 = vsel %vm1076_vm10, %v1068_v19, %v1084_v32 }
 0x226   : > { %v1021_v40 = vadd.f32 %v2325_v47, %v878_v36  ;;  %v1121_v41 = vsel %vm791_vm2, %v1099_v37, -inf  ;;  %v1100_v42 = vsel %vm791_vm2, %v1092_v39, -inf  ;;  %vm1077_vm11 = vcmp.ge.f32.partialorder %v1069_v33, 0.0 }
 0x227   : > { %1122 = vmax.xlane.f32.xlu0 %v1121_v41  ;;  %1101 = vmax.xlane.f32.xlu1 %v1100_v42  ;;  %v1085_v43 = vmul.f32 0.2, %v1069_v33  ;;  %vm1078_vm12 = vcmp.ge.f32.partialorder %v1070_v34, 0.0  ;;  %v1086_v44 = vmul.f32 0.2, %v1070_v34  ;;  %v378_v41 = vsub.s32 1, %v2177_v2 }
 0x228   : > { %v1071_v45 = vmul.f32 %v1644_v21, %v1021_v40  ;;  %v549_v40 = vpop.f32.mrb[0].mxu0 }
 0x229   : > { %v1093_v46 = vsel %vm1077_vm11, %v1069_v33, %v1085_v43  ;;  %v1094_v48 = vsel %vm1078_vm12, %v1070_v34, %v1086_v44  ;;  %v551_v42 = vpop.f32.mrb[1].mxu0  ;;  %v374_v43 = vsub.s32 0, %v2177_v2  ;;  %v379_v44 = vrot.slane %v2281_v38, %v378_v41 }
 0x22a   : > { %v1103_v49 = vsel %vm791_vm2, %v1093_v46, -inf  ;;  %v1106_v50 = vsel %vm791_vm2, %v1094_v48, -inf  ;;  %vm1079_vm13 = vcmp.ge.f32.partialorder %v1071_v45, 0.0  ;;  %v1087_v51 = vmul.f32 0.2, %v1071_v45 }
 0x22b   : > { %1104 = vmax.xlane.f32.xlu0 %v1103_v49  ;;  %1107 = vmax.xlane.f32.xlu1 %v1106_v50  ;;  %v375_v49 = vrot.slane %v2281_v38, %v374_v43  ;;  %v2388_v50 = vadd.f32 %v551_v42, %v379_v44 }
 0x22c   : > { %v1095_v47 = vsel %vm1079_vm13, %v1071_v45, %v1087_v51  ;;  %v553_v45 = vpop.f32.mrb[2].mxu0 }
 0x22d   : > { %v1109_v52 = vsel %vm791_vm2, %v1095_v47, -inf }
 0x22f   : > { %1110 = vmax.xlane.f32.xlu0 %v1109_v52  ;;  %v2395_v52 = vadd.f32 %v553_v45, %v375_v49 }
 0x2ab   : > { %v1114_v53 = vpop.xlane.xlu1 %1113 }
 0x2ac   : > { %v1128_v54 = vsub.f32 %v1096_v6, %v1114_v53 }
 0x2ad   : > { %v1117_v55 = vpop.xlane.xlu0 %1116 }
 0x2ae   : > { %v1140_v35 = vmul.f32 1.442695, %v1128_v54  ;;  %v1129_v56 = vsub.f32 %v1097_v15, %v1117_v55 }
 0x2b0   : > { %1935 = vpow2.f32 %v1140_v35  ;;  %v1142_v57 = vmul.f32 1.442695, %v1129_v56  ;;  %v1120_v58 = vpop.xlane.xlu1 %1119 }
 0x2b1   : > { %v1130_v59 = vsub.f32 %v1098_v25, %v1120_v58 }
 0x2b2   : > { %1937 = vpow2.f32 %v1142_v57 }
 0x2b3   : > { %v1144_v60 = vmul.f32 1.442695, %v1130_v59 }
 0x2b4   : > { %v1123_v61 = vpop.xlane.xlu0 %1122  ;;  %v1102_v62 = vpop.xlane.xlu1 %1101 }
 0x2b5   : > { %1939 = vpow2.f32 %v1144_v60  ;;  %v1131_v63 = vsub.f32 %v1099_v37, %v1123_v61  ;;  %v1124_v0 = vsub.f32 %v1092_v39, %v1102_v62  ;;  %v668_v37 = vmul.u32 64, %v2177_v2 }
 0x2b7   : > { %v1146_v4 = vmul.f32 1.442695, %v1131_v63  ;;  %v1132_v5 = vmul.f32 1.442695, %v1124_v0  ;;  %v670_v39 = vadd.s32 64, %v668_v37  ;;  %vm669_vm14 = vcmp.ge.s32.totalorder %v2179_v3, %v668_v37 }
 0x2b8   : > { %v1105_v7 = vpop.xlane.xlu0 %1104  ;;  %v1108_v8 = vpop.xlane.xlu1 %1107 }
 0x2b9   : > { %1941 = vpow2.f32 %v1146_v4  ;;  %v1125_v6 = vsub.f32 %v1093_v46, %v1105_v7  ;;  %v1126_v9 = vsub.f32 %v1094_v48, %v1108_v8  ;;  %vm671_vm15 = vcmp.lt.s32.totalorder %v2179_v3, %v670_v39  ;;  %v555_v46 = vpop.f32.mrb[3].mxu0 }
 0x2ba   : > { %v2348_v11 = vpop.eup %1935  ;;  %1943 = vpow2.f32 %v1132_v5  ;;  %vm672_vm0 = vmand %vm669_vm14, %vm671_vm15  ;;  %v2390_v51 = vadd.f32 %v555_v46, %v379_v44  ;;  %v1657_v44 = vld [vmem:[%s333_s17] ss:$0 sm:$0xff] }
 0x2bb   : > { %v1134_v12 = vmul.f32 1.442695, %v1125_v6  ;;  %v1136_v13 = vmul.f32 1.442695, %v1126_v9  ;;  %v1160_v14 = vsel %vm791_vm2, %v2348_v11, 0.0  ;;  %v1625_v48 = vsel %vm672_vm0, 1.0, %v2063_v1 }
 0x2bc   : > { %v2352_v15 = vpop.eup %1937  ;;  %v1111_v16 = vpop.xlane.xlu0 %1110  ;;  %1161 = vadd.xlane.f32.xlu1 %v1160_v14  ;;  %1732 = vmatprep.subr.msk.mxu0 %vm688_vm1, %v1625_v48  ;;  %v1193_v53 = vpack.c.bf16 %v2390_v51, %v2388_v50 }
 0x2bd   : > { %1945 = vpow2.f32 %v1134_v12  ;;  %v1127_v17 = vsub.f32 %v1095_v47, %v1111_v16  ;;  %v1163_v18 = vsel %vm791_vm2, %v2352_v15, 0.0  ;;  %1733 = vmatpush3.msk.msra.mxu0 %vm688_vm1, %v1625_v48  ;;  %v2393_v47 = vadd.f32 %v549_v40, %v375_v49 }
 0x2be   : > { %1947 = vpow2.f32 %v1136_v13  ;;  %1164 = vadd.xlane.f32.xlu0 %v1163_v18  ;;  %1735 = vmatmul.mubr.msk.f32.vlgmr.msra.gmra.mrb[4].mxu0 %vm675_vm3, %v2231_v22  ;;  %v2410_v22 = vsel %vm778_vm5, 1.0, %v2063_v1 }
 0x2bf   : > { %v2356_v19 = vpop.eup %1939  ;;  %v1138_v21 = vmul.f32 1.442695, %v1127_v17  ;;  %1737 = vmatprep.mubr.msk.f32.mxu0 %vm675_vm3, %v2252_v27  ;;  %v1192_v38 = vpack.c.bf16 %v2395_v52, %v2393_v47  ;;  %1756 = vmatprep.subr.bf16.mxu0 %v1193_v53  ;;  %v1898_v27 = vpack.i.bf16 %v2410_v22, %v1631_v20 }
 0x2c0   : > { %v1166_v23 = vsel %vm791_vm2, %v2356_v19, 0.0  ;;  %1757 = vmatpush3.bf16.msra.mxu0 %v1193_v53 }
 0x2c1   : > { %1949 = vpow2.f32 %v1138_v21  ;;  %1167 = vadd.xlane.f32.xlu1 %v1166_v23  ;;  %1762 = vmatprep.subr.bf16.mxu0 %v1192_v38 }
 0x2c2   : > { %1738 = vmatmul.mubr.msk.f32.gmra.mrb[6].mxu0 %vm675_vm3, %v2257_v28 }
 0x2c3   : > { %v2360_v24 = vpop.eup %1941 }
 0x2c4   : > { %v2362_v25 = vpop.eup %1943  ;;  %v1169_v26 = vsel %vm791_vm2, %v2360_v24, 0.0 }
 0x2c5   : > { %1170 = vadd.xlane.f32.xlu0 %v1169_v26  ;;  %v1148_v29 = vsel %vm791_vm2, %v2362_v25, 0.0 }
 0x2c6   : > { %1149 = vadd.xlane.f32.xlu1 %v1148_v29 }
 0x2c7   : > { %v2368_v30 = vpop.eup %1945 }
 0x2c8   : > { %v2370_v31 = vpop.eup %1947  ;;  %v1151_v32 = vsel %vm791_vm2, %v2368_v30, 0.0 }
 0x2c9   : > { %1152 = vadd.xlane.f32.xlu0 %v1151_v32  ;;  %v1154_v33 = vsel %vm791_vm2, %v2370_v31, 0.0 }
 0x2ca   : > { %1155 = vadd.xlane.f32.xlu1 %v1154_v33 }
 0x2cb   : > { %v2376_v34 = vpop.eup %1949 }
 0x2cc   : > { %v1157_v36 = vsel %vm791_vm2, %v2376_v34, 0.0 }
 0x2cd   : > { %1158 = vadd.xlane.f32.xlu0 %v1157_v36 }
 0x2db   : > { %1899 = vrot.lane.b32.xlu1 %v1898_v27, %s2068_s14 }
 0x349   : > { %v1162_v54 = vpop.xlane.xlu1 %1161 }
 0x34a   : > { %1951 = vrcp.f32 %v1162_v54 }
 0x34b   : > { %v1165_v55 = vpop.xlane.xlu0 %1164 }
 0x34c   : > { %1953 = vrcp.f32 %v1165_v55 }
 0x34e   : > { %v1168_v28 = vpop.xlane.xlu1 %1167 }
 0x34f   : > { %1955 = vrcp.f32 %v1168_v28 }
 0x352   : > { %v1171_v35 = vpop.xlane.xlu0 %1170 }
 0x353   : > { %1957 = vrcp.f32 %v1171_v35  ;;  %v1150_v2 = vpop.xlane.xlu1 %1149 }
 0x354   : > { %v1952_v56 = vpop.eup %1951  ;;  %1959 = vrcp.f32 %v1150_v2 }
 0x355   : > { %v1184_v1 = vmul.f32 %v1952_v56, %v2348_v11 }
 0x356   : > { %v1954_v3 = vpop.eup %1953  ;;  %v1153_v10 = vpop.xlane.xlu0 %1152 }
 0x357   : > { %1961 = vrcp.f32 %v1153_v10  ;;  %v1185_v57 = vmul.f32 %v1954_v3, %v2352_v15  ;;  %v1156_v59 = vpop.xlane.xlu1 %1155 }
 0x359   : > { %v1190_v58 = vpack.c.bf16 %v1185_v57, %v1184_v1  ;;  %v1956_v61 = vpop.eup %1955 }
 0x35a   : > { %v1159_v60 = vpop.xlane.xlu0 %1158  ;;  %v1186_v63 = vmul.f32 %v1956_v61, %v2356_v19 }
 0x35b   : > { %1963 = vrcp.f32 %v1159_v60  ;;  %1758 = vmatprep.mubr.msk.bf16.mxu0 %vm791_vm2, %v1190_v58  ;;  %v1900_v21 = vpop.permute.xlu1 %1899 }
 0x35c   : > { %1965 = vrcp.f32 %v1156_v59  ;;  %v1901_v23 = vunpack.i.l.bf16 %v1900_v21  ;;  %v1902_v39 = vunpack.i.h.bf16 %v1900_v21 }
 0x35d   : > { %v1958_v62 = vpop.eup %1957 }
 0x35e   : > { %v1187_v0 = vmul.f32 %v1958_v62, %v2360_v24  ;;  %v1960_v4 = vpop.eup %1959  ;;  %v792_v24 = vsel %vm791_vm2, %v1631_v20, %v1901_v23  ;;  %v793_v40 = vsel %vm791_vm2, %v2410_v22, %v1902_v39 }
 0x35f   : > { %v1180_v8 = vmul.f32 %v1960_v4, %v2362_v25  ;;  %1776 = vmatprep.mubr.msk.f32.mxu1 %vm1308_vm6, %v792_v24 }
 0x360   : > { %v1191_v5 = vpack.c.bf16 %v1187_v0, %v1186_v63 }
 0x361   : > { %v1962_v7 = vpop.eup %1961 }
 0x362   : > { %1759 = vmatmul.mubr.msk.bf16.vlgmr.msra.gmra.mrb[8].mxu0 %vm791_vm2, %v1191_v5  ;;  %v1181_v6 = vmul.f32 %v1962_v7, %v2368_v30 }
 0x363   : > { %1763 = vmatpush3.bf16.msra.mxu0 %v1192_v38 }
 0x364   : > { %v1188_v9 = vpack.c.bf16 %v1181_v6, %v1180_v8 }
 0x365   : > { %v1964_v11 = vpop.eup %1963 }
 0x366   : > { %1764 = vmatprep.mubr.msk.bf16.mxu0 %vm791_vm2, %v1188_v9  ;;  %v1966_v12 = vpop.eup %1965  ;;  %v1183_v13 = vmul.f32 %v1964_v11, %v2376_v34 }
 0x367   : > { %v1182_v14 = vmul.f32 %v1966_v12, %v2370_v31 }
 0x369   : > { %v1189_v15 = vpack.c.bf16 %v1183_v13, %v1182_v14 }
 0x36e   : > { %1765 = vmatmul.mubr.msk.bf16.vlgmr.msra.gmra.mrb[8].mxu0 %vm791_vm2, %v1189_v15 }
 0x391   : > { %v1736_v16 = vpop.f32.mrb[4].mxu0 }
 0x392   : > { %v758_v17 = vpop.f32.mrb[5].mxu0 }
 0x395   : > { %v1739_v18 = vpop.f32.mrb[6].mxu0 }
 0x396   : > { %v768_v19 = vpop.f32.mrb[7].mxu0 }
 0x441   : > { %v1766_v25 = vpop.f32.mrb[8].mxu0 }
 0x442   : > { %v1306_v26 = vmul.f32 %v1766_v25, %v768_v19  ;;  %v1289_v29 = vpop.f32.mrb[9].mxu0 }
 0x443   : > { %v1304_v30 = vmul.f32 %v1289_v29, %v758_v17  ;;  %v1767_v31 = vpop.f32.mrb[10].mxu0 }
 0x444   : > { %v1307_v32 = vmul.f32 %v1767_v31, %v1739_v18  ;;  %v1292_v33 = vpop.f32.mrb[11].mxu0 }
 0x445   : > { %v1305_v34 = vmul.f32 %v1736_v16, %v1292_v33 }
 0x446   : > { %v1789_v36 = vpack.c.bf16 %v1307_v32, %v1306_v26 }
 0x447   : > { %v1785_v37 = vpack.c.bf16 %v1305_v34, %v1304_v30 }
 0x449   : > { %1786 = vmatprep.subr.bf16.mxu1 %v1785_v37 }
 0x44a   : > { %1788 = vmatpush3.bf16.msra.mxu1 %v1785_v37 }
 0x44b   : > { %1790 = vmatprep.subr.bf16.mxu1 %v1789_v36 }
 0x44e   : > { %1792 = vmatpush3.bf16.msra.mxu1 %v1789_v36 }
 0x451   : > { %1777 = vmatmul.mubr.msk.f32.vlgmr.msra.gmra.mrb[12].mxu1 %vm1308_vm6, %v793_v40 }
 0x524   : > { %v1778_v41 = vpop.f32.mrb[12].mxu1 }
 0x525   : > { %v1387_v42 = vadd.f32 %v1778_v41, %v2395_v52  ;;  %v1381_v43 = vpop.f32.mrb[13].mxu1 }
 0x526   : > { %v1382_v45 = vadd.f32 %v1381_v43, %v2393_v47  ;;  %1408 = sbr.rel (%p1659_p0) target bundleno = 1340 (0x53c), region = 44 }
 0x527   : > { %v1391_v46 = vadd.f32 %v1387_v42, %v2390_v51 }
 0x528   : > { %v1390_v48 = vadd.f32 %v1382_v45, %v2388_v50 }
 0x529   : > { %v1400_v49 = vadd.f32 %v1657_v44, %v1391_v46 }
 0x52a   : > { %v1399_v53 = vadd.f32 %v1657_v44, %v1390_v48 }
 0x52b   : > { %1404 = vst [vmem:[%s1402_s8 + $0x8] sm:$0xff] %v1400_v49 }
 0x52c   : > { %1403 = vst [vmem:[%s1402_s8] sm:$0xff] %v1399_v53 }
 0x533   : > { %v1409_v51 = vld [vmem:[%s2441_s7] sm:$0xff]  ;;  %v1660_v47 = vld [vmem:[%s2441_s7 + $0x10] sm:$0xff]  ;;  %v1410_v52 = vld [vmem:[%s2441_s7 + $0x8] sm:$0xff] }
 0x534   : > { %v1414_v38 = vadd.f32 %v1660_v47, %v1409_v51  ;;  %v1661_v50 = vld [vmem:[%s2441_s7 + $0x18] sm:$0xff] }
 0x535   : > { %v1415_v20 = vadd.f32 %v1661_v50, %v1410_v52 }
 0x536   : > { %v1416_v22 = vmul.f32 0.5, %v1414_v38 }
 0x537   : > { %v1417_v27 = vmul.f32 0.5, %v1415_v20 }
 0x538   : > { %v1418_v54 = vadd.f32 %v1416_v22, %v1409_v51  ;;  %v1424_v55 = vadd.f32 %v1660_v47, %v1416_v22 }
 0x539   : > { %v1419_v28 = vadd.f32 %v1417_v27, %v1410_v52  ;;  %v1425_v35 = vadd.f32 %v1661_v50, %v1417_v27 }
 0x53a   : > { %1420 = vst [vmem:[%s2441_s7] sm:$0xff] %v1418_v54  ;;  %1664 = vst [vmem:[%s2441_s7 + $0x10] sm:$0xff] %v1424_v55 }
 0x53b   : > { %1421 = vst [vmem:[%s2441_s7 + $0x8] sm:$0xff] %v1419_v28  ;;  %1665 = vst [vmem:[%s2441_s7 + $0x18] sm:$0xff] %v1425_v35 }
 0x53c PF: > { %s1671_s21 = sshll.u32 %s2049_s22, 9  ;;  %s1442_s14 = sshll.u32 %s2441_s7, 4  ;;  %s2461_s14 = int_to_ptr.vmem [resolvable:$true] %s1442_s14 }
 0x53d   : > { %s2458_s12 = scalar_lea.hbm %s2522_s5, %s1671_s21  ;;  %s2465_s13 = scalar_lea.sflag [#allocation3], %s301_s27 }
 0x53e   : > { %s1967_s15 = scalar_lea.vmem %s2461_s14, 512  ;;  %s2069_s22 = smov [#allocation2]  }
 0x53f   : > { %p1968_p1 = scmp.ne.s32.totalorder %s2461_s14, %s1967_s15  ;;  %s1971_s16 = sshll.u32 %s2069_s22, 4  ;;  %s1972_s16 = int_to_ptr.vmem [resolvable:$false] %s1971_s16 }
 0x540   : > { %s1973_s17 = scalar_lea.vmem %s1972_s16, 1024  ;;  %p1974_p5 = scmp.lt.s32.totalorder %s2461_s14, %s1972_s16 }
 0x541   : > { %p1969_p2 = pnand %p1968_p1, %p2151_p3  ;;  %p1975_p6 = scmp.lt.s32.totalorder %s1973_s17, %s1967_s15 }
 0x543   : > { %p1970_p4 = pneg %p1969_p2  ;;  %p1976_p7 = por %p1975_p6, %p1974_p5 }
 0x545   : > { %p1977_p8 = pnand %p1976_p7, %p1970_p4 }
 0x547   : > { %1980 = shalt.err (!%p1977_p8)
}
 0x548   : > { %s1981_s27 = scalar_lea.hbm %s2458_s12, 512  ;;  %s1985_s8 = scalar_lea.hbm %s2522_s5, 1024 }
 0x549   : > { %p1982_p10 = scmp.ne.s32.totalorder %s2458_s12, %s1981_s27  ;;  %p1986_p13 = scmp.lt.u32.totalorder %s2458_s12, %s2522_s5 }
 0x54a   : > { %p1987_p0 = scmp.lt.u32.totalorder %s1985_s8, %s1981_s27  ;;  %p1989_p2 = scmp.lt.u32.totalorder %s1981_s27, %s2458_s12 }
 0x54b   : > { %p1983_p11 = pnand %p1982_p10, %p2151_p3 }
 0x54c   : > { %p1988_p1 = por %p1987_p0, %p1986_p13 }
 0x54d   : > { %p1984_p12 = pneg %p1983_p11 }
 0x54e   : > { %p1990_p4 = por %p1989_p2, %p1988_p1 }
 0x550   : > { %p1991_p5 = pnand %p1990_p4, %p1984_p12 }
 0x552   : > { %1994 = shalt.err (!%p1991_p5)
}
 0x553   : > { %s2070_s11 = smov 128   ;;  %s2071_s15 = smov 8  }
 0x554   : > { %1799 = dma.vmem_to_hbm [thread:$0]  (%p2151_p3), %s2461_s14, 512, %s2458_s12, %s2465_s13, %s2070_s11, %s2070_s11, %s2071_s15  }
 0x555 PF: > { %p1805_p6 = scmp.ge.s32.totalorder %s2061_s25, 2  ;;  %s1457_s22 = sand.u32 1, %s2033_s18  }
 0x556   : > { %s1458_s16 = scalar_lea.sflag [#allocation3], %s1457_s22 }
 0x557   : > { %p1802_p7 = pnand %p1805_p6, %p2161_p9 }
 0x559   : > { %2028 = dma.done.wait (!%p1802_p7), %s1458_s16, 512  }
 0x55a   : > { %2030 = vsyncadd (!%p1802_p7), %s1458_s16, 4294966784  ;;  %s18_s25 = sadd.s32 1, %s2061_s25   ;;  %s2525_s18 = smov %s2037_s19 }
 0x55b   : > { %p15_p8 = scmp.ge.s32.totalorder %s18_s25, 6   ;;  %s2526_s19 = smov %s2041_s20 }
 0x55c   : > { %s2527_s20 = smov %s2169_s9  ;;  %s2528_s21 = smov %s2053_s23 }
 0x55d   : > { %s2529_s22 = smov %s2057_s24  ;;  %s2530_s23 = smov %s2533_s28 }
 0x55e   : > { %s2531_s24 = smov %s2537_s29  ;;  %17 = sbr.rel (!%p15_p8) target bundleno = 5 (0x5), region = 93 }
 0x565   :  { %1463 = vsyncpa [#allocation3], 1 }
 0x566   :  { %1465 = vsyncpa [#allocation3 + $0x1], 1 }

</bundles_post_ra>
